<compile_context>
chip_gen: v6e
topology: v6e:2x2x1
jax: 0.10.0
libtpu: 0.0.40
codegen_flags: <defaults>
</compile_context>

<pallas_src>
import math
import numpy as np
import jax
import jax.numpy as jnp
from jax.experimental import pallas as pl
from jax.experimental.pallas import tpu as pltpu


# ---------------------------------------------------------------------------
# Kernel: one batch tile, output laid out (tile_b, V*R*C) lane-dense.
# ---------------------------------------------------------------------------
def _binomial_kernel(x_ref, lb_ref, d_ref, base_ref, out_ref):
    tb, V = x_ref.shape                    # (tile_b, V)
    VRC = out_ref.shape[-1]                # V * R * C
    RC = VRC // V

    x = x_ref[...]                         # (tb, V)   float counts
    lb = lb_ref[...]                       # (tb, V)   log C(n, x)

    # Expand per-(b,v) values across the RC lane groups (one relayout each);
    # after this all compute runs at full lane density.
    xb = jnp.broadcast_to(x[:, :, None], (tb, V, RC)).reshape(tb, VRC)
    lbb = jnp.broadcast_to(lb[:, :, None], (tb, V, RC)).reshape(tb, VRC)

    # Weight-derived rows: stride-0 sublane broadcast of resident (1, VRC).
    db = jnp.broadcast_to(d_ref[...], (tb, VRC))       # log_p - log_1mp
    baseb = jnp.broadcast_to(base_ref[...], (tb, VRC))  # n * log_1mp

    # log_probs = lb + x*log_p + (n-x)*log_1mp  ==  x*d + (lb + n*log_1mp)
    out_ref[...] = xb * db + (lbb + baseb)


# ---------------------------------------------------------------------------
# Tile-size selection from an explicit padded-VMEM budget.
# ---------------------------------------------------------------------------
def _choose_tile_b(B, V, VRC, budget_bytes=12 << 20):
    def pad128(c):
        return ((c + 127) // 128) * 128

    # Padded f32 bytes per batch row across per-row blocks (x, lb, out),
    # double-buffered by the auto-pipeline.
    row_bytes = 2 * (2 * pad128(V) + pad128(VRC)) * 4
    tile_b = max(8, budget_bytes // row_bytes)

    if B >= 16:
        # Keep at least 2 tiles so the "parallel" batch axis can shard across
        # v7x's two TensorCores (neutral on v5e/v6e).
        half = ((pl.cdiv(B, 2) + 7) // 8) * 8
        tile_b = min(tile_b, half)

    tile_b = min(tile_b, B)
    if tile_b < B:
        tile_b = max(8, (tile_b // 8) * 8)   # sublane-aligned block rows
    nb = pl.cdiv(B, tile_b)                  # trailing partial tile is masked
    return int(tile_b), int(nb)


# ---------------------------------------------------------------------------
# Wrapper
# ---------------------------------------------------------------------------
def born_binomial_forward(x, weight, log_bcoeffs, total_count):
    """x: (B, V) int; weight: (V, R, C) f32 logits.

    Returns (log_probs, ones), each (B, V, R, C) — BornBinomial.forward.
    """
    B, V = x.shape
    _, R, C = weight.shape
    RC = R * C
    VRC = V * RC
    n = float(total_count)

    w = jnp.asarray(weight, jnp.float32).reshape(V, RC)
    lbc = jnp.asarray(log_bcoeffs, jnp.float32)

    # Hoisted weight-only transform (tiny (V,RC) work, done once per call,
    # not once per batch tile). log1p keeps the |w| >~ 16 tail correct.
    lse = jnp.log1p(jnp.exp(-jnp.abs(w)))
    log_p = jnp.minimum(w, 0.0) - lse          # log_sigmoid(w)
    log_1mp = jnp.minimum(-w, 0.0) - lse       # log1p(-exp(log_sigmoid(w)))
    d = (log_p - log_1mp).reshape(1, VRC)      # (== w exactly)
    base = (n * log_1mp).reshape(1, VRC)

    x_f = x.astype(jnp.float32)                # (B, V)
    lb = lbc[x]                                # (B, V) gather of log C(n, x)

    tile_b, nb = _choose_tile_b(B, V, VRC)

    out = pl.pallas_call(
        _binomial_kernel,
        out_shape=jax.ShapeDtypeStruct((B, VRC), jnp.float32),
        grid_spec=pltpu.PrefetchScalarGridSpec(
            num_scalar_prefetch=0,
            grid=(nb,),
            in_specs=[
                pl.BlockSpec((tile_b, V), lambda b: (b, 0)),    # x tile
                pl.BlockSpec((tile_b, V), lambda b: (b, 0)),    # log bcoeff tile
                pl.BlockSpec((1, VRC), lambda b: (0, 0)),       # d    (resident)
                pl.BlockSpec((1, VRC), lambda b: (0, 0)),       # base (resident)
            ],
            out_specs=pl.BlockSpec((tile_b, VRC), lambda b: (b, 0)),
        ),
        compiler_params=pltpu.CompilerParams(
            dimension_semantics=("parallel",),
            vmem_limit_bytes=32 * 1024 * 1024,
        ),
    )(x_f, lb, d, base)

    log_probs = out.reshape(B, V, R, C)        # contiguous split — free
    # Required by forward semantics; a constant mask, produced outside kernel.
    return log_probs, jnp.ones_like(log_probs)


# ---------------------------------------------------------------------------
# Pure numpy reference (float64) of BornBinomial.forward
# ---------------------------------------------------------------------------
def _ref_forward(x, weight, log_bcoeffs, total_count):
    xi = x.astype(np.int64)
    xf = x.astype(np.float64)
    w = weight.astype(np.float64)
    lse = np.log1p(np.exp(-np.abs(w)))
    log_p = np.minimum(w, 0.0) - lse                     # log_sigmoid(w)
    log_1mp = np.minimum(-w, 0.0) - lse                  # log1p(-exp(log_sigmoid(w)))
    lb = np.asarray(log_bcoeffs, np.float64)[xi]         # (B, V)
    xe = xf[:, :, None, None]
    out = (lb[:, :, None, None]
           + xe * log_p[None]
           + (total_count - xe) * log_1mp[None])
    return out.astype(np.float32)


if __name__ == "__main__":
    # Small shapes consistent with the module:
    #   batch B, num_variables V, num_replicas R, num_components C, num_states
    B, V, R, C = 8, 5, 2, 4
    num_states = 4
    total_count = num_states - 1

    # log binomial coefficients buffer: log C(total_count, k)
    log_bcoeffs = np.array(
        [math.lgamma(total_count + 1) - math.lgamma(k + 1)
         - math.lgamma(total_count - k + 1) for k in range(num_states)],
        np.float32)

    key = jax.random.PRNGKey(0)
    kx, kw = jax.random.split(key)
    x = jax.random.randint(kx, (B, V), 0, num_states, dtype=jnp.int32)
    p = jax.random.uniform(kw, (V, R, C), jnp.float32, 0.05, 0.95)
    weight = jnp.log(p) - jnp.log1p(-p)                  # torch.logit(uniform init)

    log_probs, ones = born_binomial_forward(x, weight, log_bcoeffs, total_count)
    log_probs = jax.block_until_ready(log_probs)

    assert log_probs.shape == (B, V, R, C)
    assert ones.shape == (B, V, R, C)
    assert bool(jnp.all(ones == 1.0))

    ref = _ref_forward(np.asarray(x), np.asarray(weight),
                       np.asarray(log_bcoeffs), total_count)
    np.testing.assert_allclose(np.asarray(log_probs), ref, rtol=1e-5, atol=1e-5)
    print("KERNEL_OK")
</pallas_src>

<mosaic_0001>
module attributes {stable_mosaic.version = 11 : i64} {
  func.func @_binomial_kernel(%arg0: i32, %arg1: memref<8x5xf32, #tpu.memory_space<vmem>>, %arg2: memref<8x5xf32, #tpu.memory_space<vmem>>, %arg3: memref<1x40xf32, #tpu.memory_space<vmem>>, %arg4: memref<1x40xf32, #tpu.memory_space<vmem>>, %arg5: memref<8x40xf32, #tpu.memory_space<vmem>>) attributes {dimension_semantics = [#tpu.dimension_semantics<parallel>], iteration_bounds = array<i64: 1>, scalar_prefetch = 0 : i64, scratch_operands = 0 : i64, tpu.core_type = #tpu.core_type<tc>, window_params = [{transform_indices = @transform_0, window_bounds = array<i64: 8, 5>}, {transform_indices = @transform_1, window_bounds = array<i64: 8, 5>}, {pipeline_mode = #tpu.pipeline_mode<synchronous>, transform_indices = @transform_2, window_bounds = array<i64: 1, 40>}, {pipeline_mode = #tpu.pipeline_mode<synchronous>, transform_indices = @transform_3, window_bounds = array<i64: 1, 40>}, {transform_indices = @transform_4, window_bounds = array<i64: 8, 40>}]} {
    %c0 = arith.constant 0 : index
    %c0_0 = arith.constant 0 : index
    %0 = vector.load %arg1[%c0, %c0_0] : memref<8x5xf32, #tpu.memory_space<vmem>>, vector<8x5xf32>
    %c0_1 = arith.constant 0 : index
    %c0_2 = arith.constant 0 : index
    %1 = vector.load %arg2[%c0_1, %c0_2] : memref<8x5xf32, #tpu.memory_space<vmem>>, vector<8x5xf32>
    %2 = vector.shape_cast %0 : vector<8x5xf32> to vector<8x5x1xf32>
    %3 = vector.shape_cast %2 : vector<8x5x1xf32> to vector<8x5x1xf32>
    %4 = vector.broadcast %3 : vector<8x5x1xf32> to vector<8x5x8xf32>
    %5 = vector.shape_cast %4 : vector<8x5x8xf32> to vector<8x40xf32>
    %6 = vector.shape_cast %1 : vector<8x5xf32> to vector<8x5x1xf32>
    %7 = vector.shape_cast %6 : vector<8x5x1xf32> to vector<8x5x1xf32>
    %8 = vector.broadcast %7 : vector<8x5x1xf32> to vector<8x5x8xf32>
    %9 = vector.shape_cast %8 : vector<8x5x8xf32> to vector<8x40xf32>
    %c0_3 = arith.constant 0 : index
    %c0_4 = arith.constant 0 : index
    %10 = vector.load %arg3[%c0_3, %c0_4] : memref<1x40xf32, #tpu.memory_space<vmem>>, vector<1x40xf32>
    %11 = vector.shape_cast %10 : vector<1x40xf32> to vector<1x40xf32>
    %12 = vector.broadcast %11 : vector<1x40xf32> to vector<8x40xf32>
    %c0_5 = arith.constant 0 : index
    %c0_6 = arith.constant 0 : index
    %13 = vector.load %arg4[%c0_5, %c0_6] : memref<1x40xf32, #tpu.memory_space<vmem>>, vector<1x40xf32>
    %14 = vector.shape_cast %13 : vector<1x40xf32> to vector<1x40xf32>
    %15 = vector.broadcast %14 : vector<1x40xf32> to vector<8x40xf32>
    %16 = arith.mulf %5, %12 : vector<8x40xf32>
    %17 = arith.addf %9, %15 : vector<8x40xf32>
    %18 = arith.addf %16, %17 : vector<8x40xf32>
    %c0_7 = arith.constant 0 : index
    %c0_8 = arith.constant 0 : index
    %19 = vector.load %arg5[%c0_7, %c0_8] : memref<8x40xf32, #tpu.memory_space<vmem>>, vector<8x40xf32>
    tpu.vector_store %arg5[%c0_7, %c0_8], %18 {strides = array<i32>} : memref<8x40xf32, #tpu.memory_space<vmem>>, vector<8x40xf32>,
    return
  }
  func.func @transform_0(%arg0: i32) -> (i32, i32) {
    %c0_i32 = arith.constant 0 : i32
    %c0_i32_0 = arith.constant 0 : i32
    return %arg0, %c0_i32 : i32, i32
  }
  func.func @transform_1(%arg0: i32) -> (i32, i32) {
    %c0_i32 = arith.constant 0 : i32
    %c0_i32_0 = arith.constant 0 : i32
    return %arg0, %c0_i32 : i32, i32
  }
  func.func @transform_2(%arg0: i32) -> (i32, i32) {
    %c0_i32 = arith.constant 0 : i32
    %c0_i32_0 = arith.constant 0 : i32
    %c0_i32_1 = arith.constant 0 : i32
    return %c0_i32, %c0_i32_0 : i32, i32
  }
  func.func @transform_3(%arg0: i32) -> (i32, i32) {
    %c0_i32 = arith.constant 0 : i32
    %c0_i32_0 = arith.constant 0 : i32
    %c0_i32_1 = arith.constant 0 : i32
    return %c0_i32, %c0_i32_0 : i32, i32
  }
  func.func @transform_4(%arg0: i32) -> (i32, i32) {
    %c0_i32 = arith.constant 0 : i32
    %c0_i32_0 = arith.constant 0 : i32
    return %arg0, %c0_i32 : i32, i32
  }
}

</mosaic_0001>

<bundles_post_ra>
// kernel: tpu_custom_call.1
= control target key start
LH: loop header
LB: loop body
LE: loop exit
PB: predicated region body
PF: predicated region fallthrough
CT: control target
= control target key end

     0   :  { %9 = vsyncpa [#allocation3], 0  ;;  %s659_s0 = inlined_call_operand.hbm [shape: f32[8,5], index: 0, kind: input, shape index: {}]   ;;  %s660_s1 = inlined_call_operand.hbm [shape: f32[8,5], index: 1, kind: input, shape index: {}]   ;;  %s661_s2 = inlined_call_operand.vmem [shape: f32[1,40], index: 2, kind: input, shape index: {}]   ;;  %s662_s3 = inlined_call_operand.vmem [shape: f32[1,40], index: 3, kind: input, shape index: {}]   ;;  %s663_s4 = inlined_call_operand.hbm [shape: f32[8,40], index: 4, kind: output, shape index: {}]  }
   0x1   :  { %10 = vsyncpa [#allocation6], 0 }
   0x2   :  { %11 = vsyncpa [#allocation4], 0  ;;  %s546_s15 = smov [#allocation2]   ;;  %s547_s17 = smov [#allocation5]  }
   0x3   :  { %s18_s16 = sshll.u32 %s546_s15, 4  ;;  %s28_s18 = sshll.u32 %s547_s17, 4  ;;  %s19_s16 = int_to_ptr.vmem [resolvable:$true] %s18_s16  ;;  %s29_s18 = int_to_ptr.vmem [resolvable:$true] %s28_s18 }
   0x4   :  { %s488_s19 = scalar_lea.vmem %s19_s16, 128  ;;  %p493_p1 = scmp.lt.s32.totalorder %s19_s16, %s19_s16 }
   0x5   :  { %p489_p0 = scmp.ne.s32.totalorder %s19_s16, %s488_s19  ;;  %p494_p2 = scmp.lt.s32.totalorder %s488_s19, %s488_s19 }
   0x7   :  { %p495_p3 = por %p494_p2, %p493_p1 }
   0x9   :  { %p496_p4 = pnand %p495_p3, %p489_p0 }
   0xb   :  { %499 = shalt.err (!%p496_p4)
}
   0xc   :  { %21 = dma.hbm_to_vmem [thread:$0]  %s659_s0, 128, %s19_s16, [#allocation3]  }
   0xd   :  { %s508_s22 = scalar_lea.vmem %s29_s18, 128  ;;  %p513_p6 = scmp.lt.s32.totalorder %s29_s18, %s29_s18 }
   0xe   :  { %p509_p5 = scmp.ne.s32.totalorder %s29_s18, %s508_s22  ;;  %p514_p7 = scmp.lt.s32.totalorder %s508_s22, %s508_s22 }
  0x10   :  { %p515_p8 = por %p514_p7, %p513_p6 }
  0x12   :  { %p516_p9 = pnand %p515_p8, %p509_p5 }
  0x14   :  { %519 = shalt.err (!%p516_p9)
}
  0x15   :  { %31 = dma.hbm_to_vmem [thread:$0]  %s660_s1, 128, %s29_s18, [#allocation6]  }
  0x16   :  { %540 = dma.done.wait [#allocation3], 128  }
  0x17   :  { %541 = vsyncadd [#allocation3], 4294967168 }
  0x18   :  { %542 = dma.done.wait [#allocation6], 128  }
  0x19   :  { %543 = vsyncadd [#allocation6], 4294967168  ;;  %v44_v0 = vlaneseq  ;;  %v42_v6 = vld [vmem:[#allocation2] sm:$0xff]  ;;  %v43_v19 = vld [vmem:[#allocation5] sm:$0xff]  ;;  %v548_v30 = vmov 1983009808  }
  0x1a   :  { %v103_v31 = vunpack.c.l.s4 %v548_v30  ;;  %v549_v38 = vmov 1934713408   ;;  %s550_s0 = smov 8   ;;  %s551_s1 = smov 16   ;;  %vm233_vm0 = vcmask 64512   ;;  %vm235_vm1 = vcmask 130048  }
  0x1b   :  { %v586_v1 = vshrl.u32 %v44_v0, 7  ;;  %v167_v39 = vunpack.c.l.s4 %v549_v38  ;;  %s552_s25 = smov 24   ;;  %s553_s26 = smov 32   ;;  %vm237_vm2 = vcmask 195584   ;;  %vm239_vm3 = vcmask 261120  }
  0x1c   :  { %v104_v34 = vunpack.c.0.s8 %v103_v31  ;;  %s554_s5 = smov [#allocation7]   ;;  %vm451_vm4 = vcmask 326656  }
  0x1d   :  { %v60_v2 = vsub.s32 2, %v586_v1  ;;  %v46_v3 = vsub.s32 0, %v586_v1  ;;  %v67_v4 = vsub.s32 3, %v586_v1  ;;  %v53_v5 = vsub.s32 1, %v586_v1  ;;  %s459_s6 = sshll.u32 %s554_s5, 4  ;;  %s460_s6 = int_to_ptr.vmem [resolvable:$true] %s459_s6 }
  0x1e   :  { %v81_v11 = vsub.s32 5, %v586_v1  ;;  %v74_v12 = vsub.s32 4, %v586_v1  ;;  %v95_v15 = vsub.s32 7, %v586_v1  ;;  %v88_v16 = vsub.s32 6, %v586_v1  ;;  %s520_s7 = scalar_lea.vmem %s460_s6, 128  ;;  %p525_p11 = scmp.lt.s32.totalorder %s460_s6, %s460_s6 }
  0x1f   :  { %v61_v7 = vrot.slane %v42_v6, %v60_v2  ;;  %v47_v8 = vrot.slane %v42_v6, %v46_v3  ;;  %v68_v9 = vrot.slane %v42_v6, %v67_v4  ;;  %v54_v10 = vrot.slane %v42_v6, %v53_v5  ;;  %p521_p10 = scmp.ne.s32.totalorder %s460_s6, %s520_s7  ;;  %p526_p12 = scmp.lt.s32.totalorder %s520_s7, %s520_s7 }
  0x20   :  { %v82_v13 = vrot.slane %v42_v6, %v81_v11  ;;  %v75_v14 = vrot.slane %v42_v6, %v74_v12  ;;  %v96_v17 = vrot.slane %v42_v6, %v95_v15  ;;  %v89_v18 = vrot.slane %v42_v6, %v88_v16 }
  0x21   :  { %63 = vbcast.lane.b32.xlu1 %v61_v7, 256  ;;  %49 = vbcast.lane.b32.xlu0 %v47_v8, 256  ;;  %v251_v20 = vrot.slane %v43_v19, %v53_v5  ;;  %v244_v21 = vrot.slane %v43_v19, %v46_v3  ;;  %v265_v22 = vrot.slane %v43_v19, %v67_v4  ;;  %v168_v45 = vunpack.c.0.s8 %v167_v39  ;;  %p527_p13 = por %p526_p12, %p525_p11 }
  0x22   :  { %v258_v23 = vrot.slane %v43_v19, %v60_v2  ;;  %v279_v24 = vrot.slane %v43_v19, %v81_v11  ;;  %v272_v25 = vrot.slane %v43_v19, %v74_v12  ;;  %v293_v26 = vrot.slane %v43_v19, %v95_v15 }
  0x23   :  { %v286_v27 = vrot.slane %v43_v19, %v88_v16  ;;  %v597_v40 = vsub.s32 %v104_v34, %v586_v1  ;;  %v608_v54 = vsub.s32 %v168_v45, %v586_v1  ;;  %p528_p0 = pnand %p527_p13, %p521_p10 }
  0x25   :  { %70 = vbcast.lane.b32.xlu1 %v68_v9, 256  ;;  %56 = vbcast.lane.b32.xlu0 %v54_v10, 256 }
  0x29   :  { %84 = vbcast.lane.b32.xlu1 %v82_v13, 256  ;;  %77 = vbcast.lane.b32.xlu0 %v75_v14, 256 }
  0x2d   :  { %98 = vbcast.lane.b32.xlu1 %v96_v17, 256  ;;  %91 = vbcast.lane.b32.xlu0 %v89_v18, 256 }
  0x31   :  { %253 = vbcast.lane.b32.xlu1 %v251_v20, 256  ;;  %246 = vbcast.lane.b32.xlu0 %v244_v21, 256 }
  0x35   :  { %267 = vbcast.lane.b32.xlu1 %v265_v22, 256  ;;  %260 = vbcast.lane.b32.xlu0 %v258_v23, 256 }
  0x39   :  { %281 = vbcast.lane.b32.xlu1 %v279_v24, 256  ;;  %274 = vbcast.lane.b32.xlu0 %v272_v25, 256 }
  0x3d   :  { %295 = vbcast.lane.b32.xlu1 %v293_v26, 256  ;;  %288 = vbcast.lane.b32.xlu0 %v286_v27, 256 }
  0x93   :  { %v64_v28 = vpop.permute.xlu1 %63  ;;  %v50_v29 = vpop.permute.xlu0 %49 }
  0x94   :  { %v100_v41 = vcombine.low %v50_v29, %v64_v28  ;;  %v101_v2 = vcombine.high %v50_v29, %v64_v28 }
  0x96   :  { %v108_v48 = vrot.slane %v100_v41, %v597_v40  ;;  %v115_v13 = vrot.slane %v101_v2, %v597_v40 }
  0x97   :  { %v71_v32 = vpop.permute.xlu1 %70  ;;  %v57_v33 = vpop.permute.xlu0 %56 }
  0x98   :  { %v116_v35 = vcombine.low %v57_v33, %v71_v32  ;;  %v117_v60 = vcombine.high %v57_v33, %v71_v32 }
  0x9a   :  { %v124_v42 = vrot.slane %v116_v35, %v597_v40  ;;  %v131_v8 = vrot.slane %v117_v60, %v597_v40 }
  0x9b   :  { %v85_v36 = vpop.permute.xlu1 %84  ;;  %v78_v37 = vpop.permute.xlu0 %77 }
  0x9c   :  { %v164_v51 = vcombine.low %v108_v48, %v124_v42  ;;  %v165_v61 = vcombine.high %v108_v48, %v124_v42  ;;  %v180_v18 = vcombine.low %v115_v13, %v131_v8 }
  0x9e   :  { %v614_v0 = vrot.slane %v164_v51, %v608_v54  ;;  %v179_v11 = vrot.slane %v165_v61, %v608_v54  ;;  %v187_v28 = vrot.slane %v180_v18, %v608_v54 }
  0x9f   :  { %v99_v43 = vpop.permute.xlu1 %98  ;;  %v92_v44 = vpop.permute.xlu0 %91 }
  0xa0   :  { %v148_v46 = vcombine.low %v85_v36, %v99_v43  ;;  %v132_v47 = vcombine.low %v78_v37, %v92_v44  ;;  %v149_v56 = vcombine.high %v85_v36, %v99_v43  ;;  %v133_v57 = vcombine.high %v78_v37, %v92_v44 }
  0xa2   :  { %v156_v49 = vrot.slane %v148_v46, %v597_v40  ;;  %v140_v50 = vrot.slane %v132_v47, %v597_v40  ;;  %v163_v3 = vrot.slane %v149_v56, %v597_v40  ;;  %v147_v1 = vrot.slane %v133_v57, %v597_v40 }
  0xa3   :  { %v603_v52 = vpop.permute.xlu1 %253  ;;  %v605_v53 = vpop.permute.xlu0 %246 }
  0xa4   :  { %v188_v55 = vcombine.low %v140_v50, %v156_v49  ;;  %v189_v58 = vcombine.high %v140_v50, %v156_v49  ;;  %v204_v14 = vcombine.low %v147_v1, %v163_v3 }
  0xa6   :  { %v611_v59 = vrot.slane %v188_v55, %v608_v54  ;;  %v203_v5 = vrot.slane %v189_v58, %v608_v54  ;;  %v211_v24 = vrot.slane %v204_v14, %v608_v54 }
  0xa7   :  { %v268_v62 = vpop.permute.xlu1 %267  ;;  %v261_v63 = vpop.permute.xlu0 %260 }
  0xa8   :  { %v213_v4 = vcombine.high %v614_v0, %v611_v59  ;;  %v313_v6 = vcombine.low %v603_v52, %v268_v62  ;;  %v297_v7 = vcombine.low %v605_v53, %v261_v63  ;;  %v212_v12 = vcombine.low %v614_v0, %v611_v59 }
  0xa9   :  { %v214_v15 = vcombine.low %v179_v11, %v203_v5  ;;  %v215_v23 = vcombine.high %v179_v11, %v203_v5  ;;  %v314_v33 = vcombine.high %v603_v52, %v268_v62  ;;  %v216_v34 = vcombine.low %v187_v28, %v211_v24 }
  0xaa   :  { %218 = vrot.lane.b32.xlu0 %v213_v4, %s550_s0  ;;  %v321_v16 = vrot.slane %v313_v6, %v597_v40  ;;  %v305_v17 = vrot.slane %v297_v7, %v597_v40  ;;  %v298_v35 = vcombine.high %v605_v53, %v261_v63  ;;  %v470_v4 = vld [vmem:[%s662_s3] ss:$0 sm:$0xff] }
  0xab   :  { %v282_v9 = vpop.permute.xlu1 %281  ;;  %v275_v10 = vpop.permute.xlu0 %274  ;;  %v328_v45 = vrot.slane %v314_v33, %v597_v40 }
  0xac   :  { %v361_v25 = vcombine.low %v305_v17, %v321_v16  ;;  %v362_v36 = vcombine.high %v305_v17, %v321_v16  ;;  %v312_v46 = vrot.slane %v298_v35, %v597_v40 }
  0xae   :  { %222 = vrot.lane.b32.xlu0 %v214_v15, %s551_s1  ;;  %v369_v37 = vrot.slane %v361_v25, %v608_v54  ;;  %v376_v47 = vrot.slane %v362_v36, %v608_v54  ;;  %v377_v50 = vcombine.low %v312_v46, %v328_v45 }
  0xaf   :  { %v296_v19 = vpop.permute.xlu1 %295  ;;  %v289_v20 = vpop.permute.xlu0 %288 }
  0xb0   :  { %v345_v21 = vcombine.low %v282_v9, %v296_v19  ;;  %v329_v22 = vcombine.low %v275_v10, %v289_v20  ;;  %v346_v29 = vcombine.high %v282_v9, %v296_v19  ;;  %v330_v30 = vcombine.high %v275_v10, %v289_v20 }
  0xb1   :  { %v384_v53 = vrot.slane %v377_v50, %v608_v54 }
  0xb2   :  { %v353_v26 = vrot.slane %v345_v21, %v597_v40  ;;  %v337_v27 = vrot.slane %v329_v22, %v597_v40  ;;  %226 = vrot.lane.b32.xlu0 %v215_v23, %s552_s25  ;;  %v360_v39 = vrot.slane %v346_v29, %v597_v40  ;;  %v344_v41 = vrot.slane %v330_v30, %v597_v40 }
  0xb4   :  { %v385_v31 = vcombine.low %v337_v27, %v353_v26  ;;  %v386_v32 = vcombine.high %v337_v27, %v353_v26  ;;  %v401_v48 = vcombine.low %v344_v41, %v360_v39 }
  0xb6   :  { %v393_v38 = vrot.slane %v385_v31, %v608_v54  ;;  %230 = vrot.lane.b32.xlu0 %v216_v34, %s553_s26  ;;  %v400_v43 = vrot.slane %v386_v32, %v608_v54  ;;  %v408_v52 = vrot.slane %v401_v48, %v608_v54  ;;  %v469_v54 = vld [vmem:[%s661_s2] ss:$0 sm:$0xff] }
  0xb8   :  { %v410_v42 = vcombine.high %v369_v37, %v393_v38  ;;  %v409_v44 = vcombine.low %v369_v37, %v393_v38  ;;  %v411_v49 = vcombine.low %v376_v47, %v400_v43  ;;  %v412_v51 = vcombine.high %v376_v47, %v400_v43 }
  0xb9   :  { %v413_v55 = vcombine.low %v384_v53, %v408_v52 }
  0xba   :  { %415 = vrot.lane.b32.xlu1 %v410_v42, %s550_s0 }
  0xbe   :  { %419 = vrot.lane.b32.xlu1 %v411_v49, %s551_s1 }
  0xc2   :  { %423 = vrot.lane.b32.xlu1 %v412_v51, %s552_s25 }
  0xc6   :  { %427 = vrot.lane.b32.xlu1 %v413_v55, %s553_s26 }
 0x11c   :  { %v219_v56 = vpop.permute.xlu0 %218 }
 0x11d   :  { %v234_v60 = vsel %vm233_vm0, %v212_v12, %v219_v56 }
 0x120   :  { %v223_v57 = vpop.permute.xlu0 %222 }
 0x121   :  { %v236_v63 = vsel %vm235_vm1, %v234_v60, %v223_v57 }
 0x124   :  { %v227_v58 = vpop.permute.xlu0 %226 }
 0x125   :  { %v238_v0 = vsel %vm237_vm2, %v236_v63, %v227_v58 }
 0x128   :  { %v231_v61 = vpop.permute.xlu0 %230 }
 0x129   :  { %v240_v3 = vsel %vm239_vm3, %v238_v0, %v231_v61 }
 0x12a   :  { %v448_v8 = vmul.f32 %v469_v54, %v240_v3 }
 0x12c   :  { %v416_v40 = vpop.permute.xlu1 %415 }
 0x12d   :  { %v430_v2 = vsel %vm233_vm0, %v409_v44, %v416_v40 }
 0x130   :  { %v420_v59 = vpop.permute.xlu1 %419 }
 0x131   :  { %v431_v1 = vsel %vm235_vm1, %v430_v2, %v420_v59 }
 0x134   :  { %v424_v62 = vpop.permute.xlu1 %423 }
 0x135   :  { %v432_v5 = vsel %vm237_vm2, %v431_v1, %v424_v62 }
 0x138   :  { %v428_v6 = vpop.permute.xlu1 %427 }
 0x139   :  { %v433_v7 = vsel %vm239_vm3, %v432_v5, %v428_v6 }
 0x13a   :  { %v449_v9 = vadd.f32 %v470_v4, %v433_v7 }
 0x13c   :  { %v450_v10 = vadd.f32 %v449_v9, %v448_v8 }
 0x13e   :  { %452 = vst.msk [vmem:[#allocation7] sm:$0xff] %vm451_vm4, %v450_v10 }
 0x13f   :  { %531 = shalt.err (!%p528_p0)
}
 0x140   :  { %462 = dma.vmem_to_hbm [thread:$0]  %s460_s6, 128, %s663_s4, [#allocation4]  }
 0x141   :  { %544 = dma.done.wait [#allocation4], 128  }
 0x142   :  { %545 = vsyncadd [#allocation4], 4294967168 }
 0x143   :  { %466 = vsyncpa [#allocation3], 1 }
 0x144   :  { %467 = vsyncpa [#allocation6], 1 }
 0x145   :  { %468 = vsyncpa [#allocation4], 1 }

</bundles_post_ra>
